<compile_context>
chip_gen: v6e
topology: v6e:2x2x1
jax: 0.10.0
libtpu: 0.0.40
codegen_flags: <defaults>
</compile_context>

<pallas_src>
import functools

import jax
import jax.numpy as jnp
from jax import lax
from jax.experimental import pallas as pl
from jax.experimental.pallas import tpu as pltpu


# ----------------------------------------------------------------------------
# Fused kernel: convs + graph reasoning + conv_extend + BN(batch stats) + residual
# ----------------------------------------------------------------------------
def _glore_fused_kernel(x_ref, ws_ref, bs_ref, wp_ref, bp_ref,
                        w1t_ref, b1_ref, w2_ref, we_ref, g_ref, bt_ref,
                        o_ref, xs2_ref,
                        *, n_batch, seq_len, normalize, inv_l, inv_count, eps, dot_dtype):
    L = seq_len
    x = x_ref[...]                                                    # (C, N*L) f32
    xd = x.astype(dot_dtype)

    # conv_state / conv_proj: 1x1 convs over pixels == channel-mixing matmuls,
    # batched over the whole batch (RHS is 512 lanes wide).
    x_state = jnp.dot(ws_ref[...], xd,
                      preferred_element_type=jnp.float32) + bs_ref[...]   # (num_s, N*L)
    x_proj = jnp.dot(wp_ref[...], xd,
                     preferred_element_type=jnp.float32) + bp_ref[...]    # (num_n, N*L)

    xsd = x_state.astype(dot_dtype)
    xpd = x_proj.astype(dot_dtype)
    w1t = w1t_ref[...]                                                # (num_n, num_n), pre-transposed
    b1 = b1_ref[...]                                                  # (1, num_n) f32
    w2 = w2_ref[...]                                                  # (num_s, num_s)

    # Per-sample graph-space work (tiny matmuls) — static unroll over N.
    dn_last_last = (((1,), (1,)), ((), ()))                           # contract last dims, no .T
    for n in range(n_batch):
        xs_n = xsd[:, n * L:(n + 1) * L]                              # (num_s, L)
        xp_n = xpd[:, n * L:(n + 1) * L]                              # (num_n, L)
        x_n = lax.dot_general(xs_n, xp_n, dn_last_last,
                              preferred_element_type=jnp.float32)     # (num_s, num_n)
        if normalize:
            x_n = x_n * inv_l
        # GCN: node-mixing conv (+bias), residual, ReLU, state-mixing conv (no bias)
        h = jnp.dot(x_n.astype(dot_dtype), w1t,
                    preferred_element_type=jnp.float32) + b1          # (num_s, num_n)
        h = jnp.maximum(h + x_n, 0.0)
        x_rel = jnp.dot(w2, h.astype(dot_dtype),
                        preferred_element_type=jnp.float32)           # (num_s, num_n)
        # reverse projection back to pixel space
        xs2_ref[:, n * L:(n + 1) * L] = jnp.dot(
            x_rel.astype(dot_dtype), xp_n, preferred_element_type=jnp.float32)

    # conv_extend (bias-free 1x1), again one matmul for the whole batch
    y = jnp.dot(we_ref[...], xs2_ref[...].astype(dot_dtype),
                preferred_element_type=jnp.float32)                   # (C, N*L) f32

    # Training-mode BatchNorm (biased batch variance, eps=1e-4) + residual, all in VMEM.
    mean = jnp.sum(y, axis=1, keepdims=True) * inv_count              # (C, 1)
    var = jnp.sum(y * y, axis=1, keepdims=True) * inv_count - mean * mean
    var = jnp.maximum(var, 0.0)                                       # f32 cancellation guard
    scale = g_ref[...] * lax.rsqrt(var + eps)                         # (C, 1)
    shift = bt_ref[...] - mean * scale                                # (C, 1)
    o_ref[...] = x + y * scale + shift                                # lane-dense (C, N*L) store


# ----------------------------------------------------------------------------
# Wrapper
# ----------------------------------------------------------------------------
def glore_unit_forward(x_nchw, p, *, normalize=False, eps=1e-4, dot_dtype=jnp.float32):
    N, C, H, W = x_nchw.shape
    L = H * W
    NL = N * L
    num_s = p['w_state'].shape[0]
    num_n = p['w_proj'].shape[0]

    # Channel-major, lane-dense layout: (C, N*L).  The 1x1 convs become single
    # whole-batch matmuls inside the kernel.
    xw = jnp.transpose(x_nchw.reshape(N, C, L).astype(jnp.float32), (1, 0, 2)).reshape(C, NL)

    # Pre-cast the matmul weights to the MXU input dtype (no in-kernel astype) and
    # pre-transpose the GCN node-mixing weight (no in-kernel .T).  Biases / BN affine
    # stay f32 (elementwise path).
    w_state = p['w_state'].astype(dot_dtype)
    w_proj = p['w_proj'].astype(dot_dtype)
    w_gcn1_t = p['w_gcn1'].T.astype(dot_dtype)
    w_gcn2 = p['w_gcn2'].astype(dot_dtype)
    w_extend = p['w_extend'].astype(dot_dtype)

    def full(shape):
        return pl.BlockSpec(shape, lambda i, _s=shape: (0,) * len(_s))

    out = pl.pallas_call(
        functools.partial(_glore_fused_kernel, n_batch=N, seq_len=L,
                          normalize=normalize, inv_l=1.0 / L,
                          inv_count=1.0 / NL, eps=eps, dot_dtype=dot_dtype),
        grid=(1,),
        in_specs=[
            full((C, NL)),                 # x, channel-major
            full((num_s, C)),              # conv_state weight
            full((num_s, 1)),              # conv_state bias
            full((num_n, C)),              # conv_proj weight
            full((num_n, 1)),              # conv_proj bias
            full((num_n, num_n)),          # GCN conv1 weight (pre-transposed)
            full((1, num_n)),              # GCN conv1 bias
            full((num_s, num_s)),          # GCN conv2 weight
            full((C, num_s)),              # conv_extend weight
            full((C, 1)),                  # BN gamma
            full((C, 1)),                  # BN beta
        ],
        out_specs=full((C, NL)),
        out_shape=jax.ShapeDtypeStruct((C, NL), jnp.float32),
        scratch_shapes=[pltpu.VMEM((num_s, NL), jnp.float32)],        # x_state2 slab
        input_output_aliases={0: 0},       # xw is dead after the call; reuse its buffer
        compiler_params=pltpu.CompilerParams(dimension_semantics=("arbitrary",)),
    )(xw, w_state, p['b_state'], w_proj, p['b_proj'],
      w_gcn1_t, p['b_gcn1'], w_gcn2, w_extend,
      p['bn_gamma'], p['bn_beta'])

    return out.reshape(C, N, L).transpose(1, 0, 2).reshape(N, C, H, W)


# ----------------------------------------------------------------------------
# Deterministic synthetic parameters
# ----------------------------------------------------------------------------
def init_params(key, num_in, num_mid):
    num_s, num_n = 2 * num_mid, num_mid
    keys = iter(jax.random.split(key, 16))
    nrm = lambda shape, s=0.1: s * jax.random.normal(next(keys), shape, jnp.float32)
    p = {}
    p['w_state'] = nrm((num_s, num_in))       # Conv2d(num_in, num_s, 1)
    p['b_state'] = nrm((num_s, 1))
    p['w_proj'] = nrm((num_n, num_in))        # Conv2d(num_in, num_n, 1)
    p['b_proj'] = nrm((num_n, 1))
    p['w_gcn1'] = nrm((num_n, num_n))         # GCN conv1 (node mixing), see TODO(synk)
    p['b_gcn1'] = nrm((1, num_n))
    p['w_gcn2'] = nrm((num_s, num_s))         # GCN conv2 (state mixing), bias=False
    p['w_extend'] = nrm((num_in, num_s))      # Conv2d(num_s, num_in, 1), bias=False
    p['bn_gamma'] = 1.0 + nrm((num_in, 1))    # blocker BatchNorm2d(num_in, eps=1e-4)
    p['bn_beta'] = nrm((num_in, 1))
    return p


# ----------------------------------------------------------------------------
# Pure-JAX reference (mirrors the PyTorch forward) for a tolerance check
# ----------------------------------------------------------------------------
def glore_unit_reference(x, p, *, normalize=False, eps=1e-4):
    N, C, H, W = x.shape
    L = H * W
    x2 = x.reshape(N, C, L).astype(jnp.float32)
    xs = jnp.einsum('sc,ncl->nsl', p['w_state'], x2) + p['b_state'][None]
    xpj = jnp.einsum('mc,ncl->nml', p['w_proj'], x2) + p['b_proj'][None]
    xn = jnp.einsum('nsl,nml->nsm', xs, xpj)
    if normalize:
        xn = xn / L
    h = jnp.einsum('nsm,jm->nsj', xn, p['w_gcn1']) + p['b_gcn1'][None]
    h = jnp.maximum(h + xn, 0.0)
    xr = jnp.einsum('st,ntm->nsm', p['w_gcn2'], h)
    xs2 = jnp.einsum('nsm,nml->nsl', xr, xpj)
    y = jnp.einsum('cs,nsl->ncl', p['w_extend'], xs2)
    mean = jnp.mean(y, axis=(0, 2), keepdims=True)
    var = jnp.mean(jnp.square(y), axis=(0, 2), keepdims=True) - jnp.square(mean)
    ybn = p['bn_gamma'][None] * (y - mean) * jax.lax.rsqrt(var + eps) + p['bn_beta'][None]
    return (x2 + ybn).reshape(N, C, H, W)


if __name__ == "__main__":
    # GloRe_Unit(num_in=32, num_mid=16) -> num_s=32, num_n=16;  x: (2, 32, 16, 16), L=256
    N, num_in, num_mid, H, W = 2, 32, 16, 16, 16

    key = jax.random.PRNGKey(0)
    k_param, k_x = jax.random.split(key)
    params = init_params(k_param, num_in, num_mid)
    x = jax.random.normal(k_x, (N, num_in, H, W), jnp.float32)

    ref = glore_unit_reference(x, params)

    # f32 MXU-input path (tight numerics check)
    fwd = jax.jit(functools.partial(glore_unit_forward, dot_dtype=jnp.float32))
    out = fwd(x, params)
    jax.block_until_ready(out)
    assert out.shape == (N, num_in, H, W)
    max_err = float(jnp.max(jnp.abs(out - ref)))
    assert max_err < 1e-2, f"f32 kernel mismatch vs reference: max_err={max_err}"

    # bf16 MXU-input path (recommended on v6e/v7x; f32 accumulation + f32 elementwise,
    # so it is also safe on v5e) — looser tolerance since bf16 error feeds the BN stats.
    fwd_bf16 = jax.jit(functools.partial(glore_unit_forward, dot_dtype=jnp.bfloat16))
    out_bf16 = fwd_bf16(x, params)
    jax.block_until_ready(out_bf16)
    assert bool(jnp.all(jnp.isfinite(out_bf16)))
    bf16_err = float(jnp.max(jnp.abs(out_bf16 - ref)))
    assert bf16_err < 0.5, f"bf16 kernel mismatch vs reference: max_err={bf16_err}"

    print("KERNEL_OK")
</pallas_src>

<mosaic_0001>
module attributes {stable_mosaic.version = 11 : i64} {
  func.func @_glore_fused_kernel(%arg0: i32, %arg1: memref<32x512xf32, #tpu.memory_space<vmem>>, %arg2: memref<32x32xf32, #tpu.memory_space<vmem>>, %arg3: memref<32x1xf32, #tpu.memory_space<vmem>>, %arg4: memref<16x32xf32, #tpu.memory_space<vmem>>, %arg5: memref<16x1xf32, #tpu.memory_space<vmem>>, %arg6: memref<16x16xf32, #tpu.memory_space<vmem>>, %arg7: memref<1x16xf32, #tpu.memory_space<vmem>>, %arg8: memref<32x32xf32, #tpu.memory_space<vmem>>, %arg9: memref<32x32xf32, #tpu.memory_space<vmem>>, %arg10: memref<32x1xf32, #tpu.memory_space<vmem>>, %arg11: memref<32x1xf32, #tpu.memory_space<vmem>>, %arg12: memref<32x512xf32, #tpu.memory_space<vmem>>, %arg13: memref<32x512xf32, #tpu.memory_space<vmem>>) attributes {dimension_semantics = [#tpu.dimension_semantics<arbitrary>], iteration_bounds = array<i64: 1>, scalar_prefetch = 0 : i64, scratch_operands = 1 : i64, tpu.core_type = #tpu.core_type<tc>, window_params = [{pipeline_mode = #tpu.pipeline_mode<synchronous>, transform_indices = @transform_0, window_bounds = array<i64: 32, 512>}, {pipeline_mode = #tpu.pipeline_mode<synchronous>, transform_indices = @transform_1, window_bounds = array<i64: 32, 32>}, {pipeline_mode = #tpu.pipeline_mode<synchronous>, transform_indices = @transform_2, window_bounds = array<i64: 32, 1>}, {pipeline_mode = #tpu.pipeline_mode<synchronous>, transform_indices = @transform_3, window_bounds = array<i64: 16, 32>}, {pipeline_mode = #tpu.pipeline_mode<synchronous>, transform_indices = @transform_4, window_bounds = array<i64: 16, 1>}, {pipeline_mode = #tpu.pipeline_mode<synchronous>, transform_indices = @transform_5, window_bounds = array<i64: 16, 16>}, {pipeline_mode = #tpu.pipeline_mode<synchronous>, transform_indices = @transform_6, window_bounds = array<i64: 1, 16>}, {pipeline_mode = #tpu.pipeline_mode<synchronous>, transform_indices = @transform_7, window_bounds = array<i64: 32, 32>}, {pipeline_mode = #tpu.pipeline_mode<synchronous>, transform_indices = @transform_8, window_bounds = array<i64: 32, 32>}, {pipeline_mode = #tpu.pipeline_mode<synchronous>, transform_indices = @transform_9, window_bounds = array<i64: 32, 1>}, {pipeline_mode = #tpu.pipeline_mode<synchronous>, transform_indices = @transform_10, window_bounds = array<i64: 32, 1>}, {pipeline_mode = #tpu.pipeline_mode<synchronous>, transform_indices = @transform_11, window_bounds = array<i64: 32, 512>}]} {
    %c0 = arith.constant 0 : index
    %c0_0 = arith.constant 0 : index
    %0 = vector.load %arg1[%c0, %c0_0] : memref<32x512xf32, #tpu.memory_space<vmem>>, vector<32x512xf32>
    %c0_1 = arith.constant 0 : index
    %c0_2 = arith.constant 0 : index
    %1 = vector.load %arg2[%c0_1, %c0_2] : memref<32x32xf32, #tpu.memory_space<vmem>>, vector<32x32xf32>
    %cst = arith.constant dense<0.000000e+00> : vector<32x512xf32>
    %2 = tpu.matmul %1, %0, %cst {dimension_numbers = #tpu.dot_dimension_numbers<[1], [0], [0], [1], [0, 0, 1, 1], [], []>} : vector<32x32xf32>, vector<32x512xf32>, vector<32x512xf32> -> vector<32x512xf32>
    %c0_3 = arith.constant 0 : index
    %c0_4 = arith.constant 0 : index
    %3 = vector.load %arg3[%c0_3, %c0_4] : memref<32x1xf32, #tpu.memory_space<vmem>>, vector<32x1xf32>
    %4 = vector.broadcast %3 : vector<32x1xf32> to vector<32x512xf32>
    %5 = arith.addf %2, %4 : vector<32x512xf32>
    %c0_5 = arith.constant 0 : index
    %c0_6 = arith.constant 0 : index
    %6 = vector.load %arg4[%c0_5, %c0_6] : memref<16x32xf32, #tpu.memory_space<vmem>>, vector<16x32xf32>
    %cst_7 = arith.constant dense<0.000000e+00> : vector<16x512xf32>
    %7 = tpu.matmul %6, %0, %cst_7 {dimension_numbers = #tpu.dot_dimension_numbers<[1], [0], [0], [1], [0, 0, 1, 1], [], []>} : vector<16x32xf32>, vector<32x512xf32>, vector<16x512xf32> -> vector<16x512xf32>
    %c0_8 = arith.constant 0 : index
    %c0_9 = arith.constant 0 : index
    %8 = vector.load %arg5[%c0_8, %c0_9] : memref<16x1xf32, #tpu.memory_space<vmem>>, vector<16x1xf32>
    %9 = vector.broadcast %8 : vector<16x1xf32> to vector<16x512xf32>
    %10 = arith.addf %7, %9 : vector<16x512xf32>
    %c0_10 = arith.constant 0 : index
    %c0_11 = arith.constant 0 : index
    %11 = vector.load %arg6[%c0_10, %c0_11] : memref<16x16xf32, #tpu.memory_space<vmem>>, vector<16x16xf32>
    %c0_12 = arith.constant 0 : index
    %c0_13 = arith.constant 0 : index
    %12 = vector.load %arg7[%c0_12, %c0_13] : memref<1x16xf32, #tpu.memory_space<vmem>>, vector<1x16xf32>
    %c0_14 = arith.constant 0 : index
    %c0_15 = arith.constant 0 : index
    %13 = vector.load %arg8[%c0_14, %c0_15] : memref<32x32xf32, #tpu.memory_space<vmem>>, vector<32x32xf32>
    %14 = vector.extract_strided_slice %5 {offsets = [0, 0], sizes = [32, 256], strides = [1, 1]} : vector<32x512xf32> to vector<32x256xf32>
    %15 = vector.extract_strided_slice %10 {offsets = [0, 0], sizes = [16, 256], strides = [1, 1]} : vector<16x512xf32> to vector<16x256xf32>
    %cst_16 = arith.constant dense<0.000000e+00> : vector<32x16xf32>
    %16 = tpu.matmul %14, %15, %cst_16 {dimension_numbers = #tpu.dot_dimension_numbers<[1], [1], [0], [0], [0, 0, 1, 0], [], []>} : vector<32x256xf32>, vector<16x256xf32>, vector<32x16xf32> -> vector<32x16xf32>
    %cst_17 = arith.constant dense<0.000000e+00> : vector<32x16xf32>
    %17 = tpu.matmul %16, %11, %cst_17 {dimension_numbers = #tpu.dot_dimension_numbers<[1], [0], [0], [1], [0, 0, 1, 1], [], []>} : vector<32x16xf32>, vector<16x16xf32>, vector<32x16xf32> -> vector<32x16xf32>
    %18 = vector.broadcast %12 : vector<1x16xf32> to vector<32x16xf32>
    %19 = arith.addf %17, %18 : vector<32x16xf32>
    %20 = arith.addf %19, %16 : vector<32x16xf32>
    %cst_18 = arith.constant 0.000000e+00 : f32
    %21 = vector.broadcast %cst_18 : f32 to vector<32x16xf32>
    %22 = arith.maximumf %20, %21 : vector<32x16xf32>
    %cst_19 = arith.constant dense<0.000000e+00> : vector<32x16xf32>
    %23 = tpu.matmul %13, %22, %cst_19 {dimension_numbers = #tpu.dot_dimension_numbers<[1], [0], [0], [1], [0, 0, 1, 1], [], []>} : vector<32x32xf32>, vector<32x16xf32>, vector<32x16xf32> -> vector<32x16xf32>
    %cst_20 = arith.constant dense<0.000000e+00> : vector<32x256xf32>
    %24 = tpu.matmul %23, %15, %cst_20 {dimension_numbers = #tpu.dot_dimension_numbers<[1], [0], [0], [1], [0, 0, 1, 1], [], []>} : vector<32x16xf32>, vector<16x256xf32>, vector<32x256xf32> -> vector<32x256xf32>
    %c0_21 = arith.constant 0 : index
    %c0_22 = arith.constant 0 : index
    %25 = vector.load %arg13[%c0_21, %c0_22] : memref<32x512xf32, #tpu.memory_space<vmem>>, vector<32x256xf32>
    tpu.vector_store %arg13[%c0_21, %c0_22], %24 {strides = array<i32>} : memref<32x512xf32, #tpu.memory_space<vmem>>, vector<32x256xf32>,
    %26 = vector.extract_strided_slice %5 {offsets = [0, 256], sizes = [32, 256], strides = [1, 1]} : vector<32x512xf32> to vector<32x256xf32>
    %27 = vector.extract_strided_slice %10 {offsets = [0, 256], sizes = [16, 256], strides = [1, 1]} : vector<16x512xf32> to vector<16x256xf32>
    %cst_23 = arith.constant dense<0.000000e+00> : vector<32x16xf32>
    %28 = tpu.matmul %26, %27, %cst_23 {dimension_numbers = #tpu.dot_dimension_numbers<[1], [1], [0], [0], [0, 0, 1, 0], [], []>} : vector<32x256xf32>, vector<16x256xf32>, vector<32x16xf32> -> vector<32x16xf32>
    %cst_24 = arith.constant dense<0.000000e+00> : vector<32x16xf32>
    %29 = tpu.matmul %28, %11, %cst_24 {dimension_numbers = #tpu.dot_dimension_numbers<[1], [0], [0], [1], [0, 0, 1, 1], [], []>} : vector<32x16xf32>, vector<16x16xf32>, vector<32x16xf32> -> vector<32x16xf32>
    %30 = vector.broadcast %12 : vector<1x16xf32> to vector<32x16xf32>
    %31 = arith.addf %29, %30 : vector<32x16xf32>
    %32 = arith.addf %31, %28 : vector<32x16xf32>
    %cst_25 = arith.constant 0.000000e+00 : f32
    %33 = vector.broadcast %cst_25 : f32 to vector<32x16xf32>
    %34 = arith.maximumf %32, %33 : vector<32x16xf32>
    %cst_26 = arith.constant dense<0.000000e+00> : vector<32x16xf32>
    %35 = tpu.matmul %13, %34, %cst_26 {dimension_numbers = #tpu.dot_dimension_numbers<[1], [0], [0], [1], [0, 0, 1, 1], [], []>} : vector<32x32xf32>, vector<32x16xf32>, vector<32x16xf32> -> vector<32x16xf32>
    %cst_27 = arith.constant dense<0.000000e+00> : vector<32x256xf32>
    %36 = tpu.matmul %35, %27, %cst_27 {dimension_numbers = #tpu.dot_dimension_numbers<[1], [0], [0], [1], [0, 0, 1, 1], [], []>} : vector<32x16xf32>, vector<16x256xf32>, vector<32x256xf32> -> vector<32x256xf32>
    %c0_28 = arith.constant 0 : index
    %c256 = arith.constant 256 : index
    %37 = vector.load %arg13[%c0_28, %c256] : memref<32x512xf32, #tpu.memory_space<vmem>>, vector<32x256xf32>
    tpu.vector_store %arg13[%c0_28, %c256], %36 {strides = array<i32>} : memref<32x512xf32, #tpu.memory_space<vmem>>, vector<32x256xf32>,
    %c0_29 = arith.constant 0 : index
    %c0_30 = arith.constant 0 : index
    %38 = vector.load %arg9[%c0_29, %c0_30] : memref<32x32xf32, #tpu.memory_space<vmem>>, vector<32x32xf32>
    %c0_31 = arith.constant 0 : index
    %c0_32 = arith.constant 0 : index
    %39 = vector.load %arg13[%c0_31, %c0_32] : memref<32x512xf32, #tpu.memory_space<vmem>>, vector<32x512xf32>
    %cst_33 = arith.constant dense<0.000000e+00> : vector<32x512xf32>
    %40 = tpu.matmul %38, %39, %cst_33 {dimension_numbers = #tpu.dot_dimension_numbers<[1], [0], [0], [1], [0, 0, 1, 1], [], []>} : vector<32x32xf32>, vector<32x512xf32>, vector<32x512xf32> -> vector<32x512xf32>
    %cst_34 = arith.constant dense<0.000000e+00> : vector<32xf32>
    %41 = vector.multi_reduction <add>, %40, %cst_34 [1] : vector<32x512xf32> to vector<32xf32>
    %42 = vector.shape_cast %41 : vector<32xf32> to vector<32x1xf32>
    %cst_35 = arith.constant 0.001953125 : f32
    %43 = vector.broadcast %cst_35 : f32 to vector<32x1xf32>
    %44 = arith.mulf %42, %43 : vector<32x1xf32>
    %45 = arith.mulf %40, %40 : vector<32x512xf32>
    %cst_36 = arith.constant dense<0.000000e+00> : vector<32xf32>
    %46 = vector.multi_reduction <add>, %45, %cst_36 [1] : vector<32x512xf32> to vector<32xf32>
    %47 = vector.shape_cast %46 : vector<32xf32> to vector<32x1xf32>
    %cst_37 = arith.constant 0.001953125 : f32
    %48 = vector.broadcast %cst_37 : f32 to vector<32x1xf32>
    %49 = arith.mulf %47, %48 : vector<32x1xf32>
    %50 = arith.mulf %44, %44 : vector<32x1xf32>
    %51 = arith.subf %49, %50 : vector<32x1xf32>
    %cst_38 = arith.constant 0.000000e+00 : f32
    %52 = vector.broadcast %cst_38 : f32 to vector<32x1xf32>
    %53 = arith.maximumf %51, %52 : vector<32x1xf32>
    %c0_39 = arith.constant 0 : index
    %c0_40 = arith.constant 0 : index
    %54 = vector.load %arg10[%c0_39, %c0_40] : memref<32x1xf32, #tpu.memory_space<vmem>>, vector<32x1xf32>
    %cst_41 = arith.constant 9.99999974E-5 : f32
    %55 = vector.broadcast %cst_41 : f32 to vector<32x1xf32>
    %56 = arith.addf %53, %55 : vector<32x1xf32>
    %57 = math.rsqrt %56 : vector<32x1xf32>
    %58 = arith.mulf %54, %57 : vector<32x1xf32>
    %c0_42 = arith.constant 0 : index
    %c0_43 = arith.constant 0 : index
    %59 = vector.load %arg11[%c0_42, %c0_43] : memref<32x1xf32, #tpu.memory_space<vmem>>, vector<32x1xf32>
    %60 = arith.mulf %44, %58 : vector<32x1xf32>
    %61 = arith.subf %59, %60 : vector<32x1xf32>
    %62 = vector.broadcast %58 : vector<32x1xf32> to vector<32x512xf32>
    %63 = arith.mulf %40, %62 : vector<32x512xf32>
    %64 = arith.addf %0, %63 : vector<32x512xf32>
    %65 = vector.broadcast %61 : vector<32x1xf32> to vector<32x512xf32>
    %66 = arith.addf %64, %65 : vector<32x512xf32>
    %c0_44 = arith.constant 0 : index
    %c0_45 = arith.constant 0 : index
    %67 = vector.load %arg12[%c0_44, %c0_45] : memref<32x512xf32, #tpu.memory_space<vmem>>, vector<32x512xf32>
    tpu.vector_store %arg12[%c0_44, %c0_45], %66 {strides = array<i32>} : memref<32x512xf32, #tpu.memory_space<vmem>>, vector<32x512xf32>,
    return
  }
  func.func @transform_0(%arg0: i32) -> (i32, i32) {
    %c0_i32 = arith.constant 0 : i32
    %c0_i32_0 = arith.constant 0 : i32
    %c0_i32_1 = arith.constant 0 : i32
    return %c0_i32, %c0_i32_0 : i32, i32
  }
  func.func @transform_1(%arg0: i32) -> (i32, i32) {
    %c0_i32 = arith.constant 0 : i32
    %c0_i32_0 = arith.constant 0 : i32
    %c0_i32_1 = arith.constant 0 : i32
    return %c0_i32, %c0_i32_0 : i32, i32
  }
  func.func @transform_2(%arg0: i32) -> (i32, i32) {
    %c0_i32 = arith.constant 0 : i32
    %c0_i32_0 = arith.constant 0 : i32
    %c0_i32_1 = arith.constant 0 : i32
    return %c0_i32, %c0_i32_0 : i32, i32
  }
  func.func @transform_3(%arg0: i32) -> (i32, i32) {
    %c0_i32 = arith.constant 0 : i32
    %c0_i32_0 = arith.constant 0 : i32
    %c0_i32_1 = arith.constant 0 : i32
    return %c0_i32, %c0_i32_0 : i32, i32
  }
  func.func @transform_4(%arg0: i32) -> (i32, i32) {
    %c0_i32 = arith.constant 0 : i32
    %c0_i32_0 = arith.constant 0 : i32
    %c0_i32_1 = arith.constant 0 : i32
    return %c0_i32, %c0_i32_0 : i32, i32
  }
  func.func @transform_5(%arg0: i32) -> (i32, i32) {
    %c0_i32 = arith.constant 0 : i32
    %c0_i32_0 = arith.constant 0 : i32
    %c0_i32_1 = arith.constant 0 : i32
    return %c0_i32, %c0_i32_0 : i32, i32
  }
  func.func @transform_6(%arg0: i32) -> (i32, i32) {
    %c0_i32 = arith.constant 0 : i32
    %c0_i32_0 = arith.constant 0 : i32
    %c0_i32_1 = arith.constant 0 : i32
    return %c0_i32, %c0_i32_0 : i32, i32
  }
  func.func @transform_7(%arg0: i32) -> (i32, i32) {
    %c0_i32 = arith.constant 0 : i32
    %c0_i32_0 = arith.constant 0 : i32
    %c0_i32_1 = arith.constant 0 : i32
    return %c0_i32, %c0_i32_0 : i32, i32
  }
  func.func @transform_8(%arg0: i32) -> (i32, i32) {
    %c0_i32 = arith.constant 0 : i32
    %c0_i32_0 = arith.constant 0 : i32
    %c0_i32_1 = arith.constant 0 : i32
    return %c0_i32, %c0_i32_0 : i32, i32
  }
  func.func @transform_9(%arg0: i32) -> (i32, i32) {
    %c0_i32 = arith.constant 0 : i32
    %c0_i32_0 = arith.constant 0 : i32
    %c0_i32_1 = arith.constant 0 : i32
    return %c0_i32, %c0_i32_0 : i32, i32
  }
  func.func @transform_10(%arg0: i32) -> (i32, i32) {
    %c0_i32 = arith.constant 0 : i32
    %c0_i32_0 = arith.constant 0 : i32
    %c0_i32_1 = arith.constant 0 : i32
    return %c0_i32, %c0_i32_0 : i32, i32
  }
  func.func @transform_11(%arg0: i32) -> (i32, i32) {
    %c0_i32 = arith.constant 0 : i32
    %c0_i32_0 = arith.constant 0 : i32
    %c0_i32_1 = arith.constant 0 : i32
    return %c0_i32, %c0_i32_0 : i32, i32
  }
}

</mosaic_0001>

<bundles_post_ra>
// kernel: glore_unit_forward.1
= control target key start
LH: loop header
LB: loop body
LE: loop exit
PB: predicated region body
PF: predicated region fallthrough
CT: control target
= control target key end

     0   :  { %v1810_v3 = vmov 0.0   ;;  %vm82_vm0 = vcmask 261120   ;;  %v1811_v24 = vmov 0   ;;  %vm545_vm1 = vcmask 130048   ;;  %s2379_s0 = inlined_call_operand.vmem [shape: f32[32,512], index: 0, kind: input, shape index: {}, may-alias: {0,11}]   ;;  %s2380_s1 = inlined_call_operand.vmem [shape: f32[32,32], index: 1, kind: input, shape index: {}]   ;;  %s2381_s3 = inlined_call_operand.vmem [shape: f32[16,32], index: 3, kind: input, shape index: {}]   ;;  %s2382_s2 = inlined_call_operand.vmem [shape: f32[32,1], index: 2, kind: input, shape index: {}]   ;;  %s2383_s4 = inlined_call_operand.vmem [shape: f32[16,1], index: 4, kind: input, shape index: {}]   ;;  %s2384_s5 = inlined_call_operand.vmem [shape: f32[16,16], index: 5, kind: input, shape index: {}]   ;;  %s2385_s7 = inlined_call_operand.vmem [shape: f32[32,32], index: 7, kind: input, shape index: {}]   ;;  %s2386_s6 = inlined_call_operand.vmem [shape: f32[1,16], index: 6, kind: input, shape index: {}]   ;;  %s2387_s8 = inlined_call_operand.vmem [shape: f32[32,32], index: 8, kind: input, shape index: {}]   ;;  %s2388_s9 = inlined_call_operand.vmem [shape: f32[32,1], index: 9, kind: input, shape index: {}]   ;;  %s2389_s10 = inlined_call_operand.vmem [shape: f32[32,1], index: 10, kind: input, shape index: {}]   ;;  %s2390_s11 = inlined_call_operand.vmem [shape: f32[32,512], index: 11, kind: output, shape index: {}, may-alias: {0,11}]  }
   0x1   :  { %v51_v0 = vld [vmem:[%s2379_s0 + $0x68] sm:$0xff]  ;;  %v50_v1 = vld [vmem:[%s2379_s0 + $0x60] sm:$0xff]  ;;  %159 = vmatprep.mubr.f32.mxu0 %v1810_v3  ;;  %171 = vmatprep.mubr.f32.mxu1 %v1810_v3  ;;  %v1916_v10 = vld [vmem:[%s2380_s1 + $0x10] sm:$0xff] }
   0x2   :  { %v47_v2 = vld [vmem:[%s2379_s0 + $0x48] sm:$0xff]  ;;  %119 = vmatprep.subr.mxu0 %v51_v0  ;;  %1784 = vmatprep.subr.mxu1 %v51_v0  ;;  %v46_v4 = vld [vmem:[%s2379_s0 + $0x40] sm:$0xff]  ;;  %v53_v11 = vld [vmem:[%s2379_s0 + $0x78] sm:$0xff] }
   0x3   :  { %120 = vmatpush1.msra.mxu0 %v50_v1  ;;  %1788 = vmatpush1.msra.mxu1 %v50_v1  ;;  %v1889_v5 = vld [vmem:[%s2379_s0 + $0x28] sm:$0xff]  ;;  %v1894_v6 = vld [vmem:[%s2379_s0 + $0x20] sm:$0xff]  ;;  %v52_v12 = vld [vmem:[%s2379_s0 + $0x70] sm:$0xff] }
   0x4   :  { %121 = vmatprep.subr.mxu0 %v47_v2  ;;  %1785 = vmatprep.subr.mxu1 %v47_v2  ;;  %v1899_v7 = vld [vmem:[%s2379_s0 + $0x8] sm:$0xff]  ;;  %v1906_v8 = vld [vmem:[%s2379_s0] sm:$0xff]  ;;  %v1934_v13 = vld [vmem:[%s2379_s0 + $0x58] sm:$0xff] }
   0x5   :  { %122 = vmatpush1.msra.mxu0 %v46_v4  ;;  %1789 = vmatpush1.msra.mxu1 %v46_v4  ;;  %v54_v9 = vld [vmem:[%s2380_s1] sm:$0xff]  ;;  %v1939_v14 = vld [vmem:[%s2379_s0 + $0x50] sm:$0xff]  ;;  %v55_v15 = vld [vmem:[%s2380_s1 + $0x8] sm:$0xff] }
   0x6   :  { %123 = vmatprep.subr.mxu0 %v1889_v5  ;;  %1786 = vmatprep.subr.mxu1 %v1889_v5  ;;  %v57_v16 = vld [vmem:[%s2380_s1 + $0x18] sm:$0xff]  ;;  %v1959_v18 = vld [vmem:[%s2379_s0 + $0x30] sm:$0xff]  ;;  %v273_v21 = vld [vmem:[%s2381_s3] sm:$0xff] }
   0x7   :  { %124 = vmatpush1.msra.mxu0 %v1894_v6  ;;  %1790 = vmatpush1.msra.mxu1 %v1894_v6  ;;  %v1953_v17 = vld [vmem:[%s2379_s0 + $0x38] sm:$0xff]  ;;  %v1973_v20 = vld [vmem:[%s2379_s0 + $0x10] sm:$0xff]  ;;  %v58_v22 = vld [vmem:[%s2382_s2] sm:$0xff] }
   0x8   :  { %125 = vmatprep.subr.mxu0 %v1899_v7  ;;  %1787 = vmatprep.subr.mxu1 %v1899_v7  ;;  %v1966_v19 = vld [vmem:[%s2379_s0 + $0x18] sm:$0xff]  ;;  %v274_v23 = vld [vmem:[%s2381_s3 + $0x8] sm:$0xff]  ;;  %v275_v27 = vld [vmem:[%s2383_s4] sm:$0xff] }
   0x9   :  { %126 = vmatpush1.msra.mxu0 %v1906_v8  ;;  %1791 = vmatpush1.msra.mxu1 %v1906_v8  ;;  %v276_v25 = vld [vmem:[%s2383_s4 + $0x8] sm:$0xff]  ;;  %v61_v28 = vld [vmem:[%s2382_s2 + $0x18] sm:$0xff]  ;;  %v60_v29 = vld [vmem:[%s2382_s2 + $0x10] sm:$0xff] }
   0xa   :  { %1663 = vmatmul.mubr.msk.f32.vlgmr.msra.gmra.mxu0 %vm82_vm0, %v54_v9  ;;  %1665 = vmatmul.mubr.msk.f32.vlgmr.msra.gmra.mxu1 %vm82_vm0, %v1916_v10  ;;  %v59_v26 = vld [vmem:[%s2382_s2 + $0x8] sm:$0xff]  ;;  %v2064_v61 = vld [vmem:[%s2384_s5] sm:$0xff] }
   0xb   :  { %208 = vmatprep.subr.mxu1 %v53_v11  ;;  %317 = vmatprep.subr.mxu0 %v51_v0  ;;  %v2056_v60 = vld [vmem:[%s2384_s5 + $0x8] sm:$0xff] }
   0xc   :  { %209 = vmatpush1.msra.mxu1 %v52_v12  ;;  %318 = vmatpush1.msra.mxu0 %v50_v1 }
   0xd   :  { %210 = vmatprep.subr.mxu1 %v1934_v13  ;;  %319 = vmatprep.subr.mxu0 %v47_v2 }
   0xe   :  { %165 = vmatprep.mubr.f32.mxu0 %v1810_v3  ;;  %177 = vmatprep.mubr.f32.mxu1 %v1810_v3 }
   0xf   :  { %211 = vmatpush1.msra.mxu1 %v1939_v14  ;;  %320 = vmatpush1.msra.mxu0 %v46_v4 }
  0x10   :  { %1664 = vmatmul.mubr.msk.f32.gmra.mxu0 %vm82_vm0, %v55_v15  ;;  %1666 = vmatmul.mubr.msk.f32.gmra.mxu1 %vm82_vm0, %v57_v16 }
  0x11   :  { %212 = vmatprep.subr.mxu1 %v1953_v17  ;;  %321 = vmatprep.subr.mxu0 %v1889_v5 }
  0x12   :  { %213 = vmatpush1.msra.mxu1 %v1959_v18  ;;  %322 = vmatpush1.msra.mxu0 %v1894_v6 }
  0x13   :  { %214 = vmatprep.subr.mxu1 %v1966_v19  ;;  %323 = vmatprep.subr.mxu0 %v1899_v7 }
  0x14   :  { %215 = vmatpush1.msra.mxu1 %v1973_v20  ;;  %248 = vmatprep.mubr.f32.mxu1 %v1810_v3 }
  0x15   :  { %324 = vmatpush1.msra.mxu0 %v1906_v8  ;;  %357 = vmatprep.mubr.f32.mxu0 %v1810_v3 }
  0x16   :  { %1667 = vmatmul.mubr.msk.f32.vlgmr.msra.gmra.mxu1 %vm82_vm0, %v54_v9  ;;  %1671 = vmatmul.mubr.msk.f32.vlgmr.msra.gmra.mxu0 %vm82_vm0, %v273_v21 }
  0x17   :  { %254 = vmatprep.mubr.f32.mxu1 %v1810_v3  ;;  %363 = vmatprep.mubr.f32.mxu0 %v1810_v3 }
  0x18   :  { %394 = vmatprep.subr.mxu1 %v53_v11  ;;  %1795 = vset.pattern.permute.xlu1 %v1811_v24  ;;  %v2075_v11 = vld [vmem:[%s2385_s7] sm:$0xff] }
  0x19   :  { %395 = vmatpush1.msra.mxu1 %v52_v12  ;;  %64 = vperm.xlu1 %1795, %v58_v22  }
  0x1a   :  { %1668 = vmatmul.mubr.msk.f32.gmra.mxu1 %vm82_vm0, %v55_v15  ;;  %1672 = vmatmul.mubr.msk.f32.gmra.mxu0 %vm82_vm0, %v274_v23 }
  0x1b   :  { %260 = vmatprep.mubr.f32.mxu1 %v1810_v3  ;;  %396 = vmatprep.subr.mxu1 %v1934_v13 }
  0x1c   :  { %397 = vmatpush1.msra.mxu1 %v1939_v14  ;;  %1794 = vset.pattern.permute.xlu0 %v1811_v24 }
  0x1d   :  { %398 = vmatprep.subr.mxu1 %v1953_v17  ;;  %284 = vperm.xlu0 %1794, %v276_v25  }
  0x1e   :  { %1669 = vmatmul.mubr.msk.f32.gmra.mxu1 %vm82_vm0, %v1916_v10  ;;  %69 = vperm.xlu1 %1795, %v59_v26  }
  0x1f   :  { %266 = vmatprep.mubr.f32.mxu1 %v1810_v3  ;;  %399 = vmatpush1.msra.mxu1 %v1959_v18 }
  0x20   :  { %400 = vmatprep.subr.mxu1 %v1966_v19 }
  0x21   :  { %401 = vmatpush1.msra.mxu1 %v1973_v20  ;;  %279 = vperm.xlu0 %1794, %v275_v27  }
  0x22   :  { %1670 = vmatmul.mubr.msk.f32.gmra.mxu1 %vm82_vm0, %v57_v16  ;;  %79 = vperm.xlu1 %1795, %v61_v28  }
  0x23   :  { %434 = vmatprep.mubr.f32.mxu1 %v1810_v3  ;;  %1736 = vmatprep.subr.mxu1 %v2056_v60 }
  0x25   :  { %74 = vperm.xlu0 %1794, %v60_v29  }
  0x26   :  { %1673 = vmatmul.mubr.msk.f32.vlgmr.msra.gmra.mxu1 %vm82_vm0, %v273_v21 }
  0x27   :  { %440 = vmatprep.mubr.f32.mxu1 %v1810_v3  ;;  %1737 = vmatpush3.msra.mxu1 %v2056_v60 }
  0x28   :  { %1738 = vmatprep.subr.mxu1 %v2064_v61 }
  0x29   :  { %1739 = vmatpush3.msra.mxu1 %v2064_v61 }
  0x2a   :  { %1674 = vmatmul.mubr.msk.f32.gmra.mxu1 %vm82_vm0, %v274_v23 }
  0x94   :  { %v2028_v31 = vpop.permute.xlu1 %64 }
  0x98   :  { %v2031_v37 = vpop.permute.xlu0 %284 }
  0x99   :  { %v2040_v49 = vpop.permute.xlu1 %69 }
  0x9c   :  { %v2034_v42 = vpop.permute.xlu0 %279 }
  0x9d   :  { %v2047_v55 = vpop.permute.xlu1 %79 }
  0xa0   :  { %v2043_v51 = vpop.permute.xlu0 %74 }
  0xca   :  { %v161_v30 = vpop.f32.mrf.mxu0  ;;  %v173_v45 = vpop.f32.mrf.mxu1 }
  0xcb   :  { %v162_v47 = vadd.f32 %v161_v30, %v2028_v31  ;;  %v174_v57 = vadd.f32 %v173_v45, %v2043_v51 }
  0xcc   :  { %v163_v32 = vpop.f32.mrf.mxu0  ;;  %v175_v48 = vpop.f32.mrf.mxu1 }
  0xcd   :  { %v164_v33 = vadd.f32 %v163_v32, %v2028_v31  ;;  %v176_v54 = vadd.f32 %v175_v48, %v2043_v51  ;;  %v2082_v32 = vld [vmem:[%s2386_s6] ss:$0 sm:$0xff] }
  0xcf   :  { %518 = vmatprep.mubr.f32.mxu0 %v164_v33 }
  0xd0   :  { %v167_v34 = vpop.f32.mrf.mxu0  ;;  %v179_v53 = vpop.f32.mrf.mxu1 }
  0xd1   :  { %v168_v52 = vadd.f32 %v167_v34, %v2040_v49  ;;  %v180_v59 = vadd.f32 %v179_v53, %v2047_v55 }
  0xd2   :  { %v169_v35 = vpop.f32.mrf.mxu0  ;;  %v181_v56 = vpop.f32.mrf.mxu1 }
  0xd3   :  { %v170_v50 = vadd.f32 %v169_v35, %v2040_v49  ;;  %v182_v58 = vadd.f32 %v181_v56, %v2047_v55 }
  0xd6   :  { %v359_v36 = vpop.f32.mrf.mxu0  ;;  %v250_v12 = vpop.f32.mrf.mxu1 }
  0xd7   :  { %v360_v46 = vadd.f32 %v359_v36, %v2034_v42 }
  0xd8   :  { %v361_v38 = vpop.f32.mrf.mxu0  ;;  %v252_v15 = vpop.f32.mrf.mxu1 }
  0xd9   :  { %v362_v44 = vadd.f32 %v361_v38, %v2034_v42 }
  0xda   :  { %v365_v39 = vpop.f32.mrf.mxu0  ;;  %v256_v16 = vpop.f32.mrf.mxu1 }
  0xdb   :  { %v366_v43 = vadd.f32 %v365_v39, %v2031_v37 }
  0xdc   :  { %v367_v40 = vpop.f32.mrf.mxu0  ;;  %v258_v21 = vpop.f32.mrf.mxu1 }
  0xdd   :  { %v368_v41 = vadd.f32 %v367_v40, %v2031_v37 }
  0xde   :  { %v262_v22 = vpop.f32.mrf.mxu1 }
  0xdf   :  { %482 = vmatprep.subr.mxu0 %v368_v41 }
  0xe0   :  { %483 = vmatpush1.xpose.msra.mxu0 %v366_v43  ;;  %v264_v23 = vpop.f32.mrf.mxu1 }
  0xe1   :  { %484 = vmatprep.subr.mxu0 %v362_v44 }
  0xe2   :  { %v268_v24 = vpop.f32.mrf.mxu1 }
  0xe4   :  { %485 = vmatpush1.xpose.msra.mxu0 %v360_v46  ;;  %v270_v25 = vpop.f32.mrf.mxu1 }
  0xe5   :  { %788 = vmatprep.subr.mxu0 %v368_v41 }
  0xe6   :  { %v436_v26 = vpop.f32.mrf.mxu1 }
  0xe7   :  { %519 = vmatmul.mubr.f32.vlgmr.msra.gmra.mxu0 %v162_v47 }
  0xe8   :  { %523 = vmatprep.mubr.f32.mxu0 %v170_v50  ;;  %789 = vmatpush1.msra.mxu0 %v366_v43  ;;  %v438_v27 = vpop.f32.mrf.mxu1 }
  0xe9   :  { %790 = vmatprep.subr.mxu0 %v362_v44 }
  0xea   :  { %791 = vmatpush1.msra.mxu0 %v360_v46  ;;  %v442_v28 = vpop.f32.mrf.mxu1 }
  0xeb   :  { %524 = vmatmul.mubr.f32.gmra.mxu0 %v168_v52  ;;  %1760 = vmatprep.subr.mxu0 %v2056_v60  ;;  %v2091_v52 = vld [vmem:[%s2385_s7 + $0x8] sm:$0xff]  ;;  %v443_v56 = vadd.f32 %v442_v28, %v2031_v37 }
  0xec   :  { %528 = vmatprep.mubr.f32.mxu0 %v176_v54  ;;  %v444_v29 = vpop.f32.mrf.mxu1  ;;  %v2097_v54 = vld [vmem:[%s2385_s7 + $0x10] sm:$0xff] }
  0xed   :  { %v445_v53 = vadd.f32 %v444_v29, %v2031_v37  ;;  %v437_v37 = vadd.f32 %v436_v26, %v2034_v42 }
  0xef   :  { %529 = vmatmul.mubr.f32.gmra.mxu0 %v174_v57  ;;  %v439_v57 = vadd.f32 %v438_v27, %v2034_v42  ;;  %v271_v42 = vadd.f32 %v270_v25, %v2047_v55 }
  0xf0   :  { %533 = vmatprep.mubr.f32.mxu0 %v182_v58  ;;  %v2108_v58 = vld [vmem:[%s2385_s7 + $0x18] sm:$0xff] }
  0xf3   :  { %534 = vmatmul.mubr.f32.gmra.mxu0 %v180_v59  ;;  %v253_v59 = vadd.f32 %v252_v15, %v2028_v31 }
  0xf4   :  { %824 = vmatprep.mubr.f32.mxu0 %v1810_v3 }
 0x1a7   :  { %v520_v62 = vpop.f32.mrf.mxu0 }
 0x1a8   :  { %1740 = vmatprep.mubr.msk.f32.mxu1 %vm545_vm1, %v520_v62 }
 0x1a9   :  { %v522_v63 = vpop.f32.mrf.mxu0 }
 0x1aa   :  { %v259_v63 = vadd.f32 %v258_v21, %v2040_v49 }
 0x1ab   :  { %v525_v0 = vpop.f32.mrf.mxu0 }
 0x1ac   :  { %1741 = vmatmul.mubr.msk.f32.vlgmr.msra.gmra.mxu1 %vm545_vm1, %v525_v0 }
 0x1ad   :  { %v527_v1 = vpop.f32.mrf.mxu0 }
 0x1ae   :  { %v265_v1 = vadd.f32 %v264_v23, %v2043_v51 }
 0x1af   :  { %v530_v2 = vpop.f32.mrf.mxu0 }
 0x1b0   :  { %1743 = vmatprep.mubr.msk.f32.mxu1 %vm545_vm1, %v530_v2 }
 0x1b1   :  { %v532_v4 = vpop.f32.mrf.mxu0 }
 0x1b2   :  { %v269_v4 = vadd.f32 %v268_v24, %v2047_v55 }
 0x1b3   :  { %v535_v9 = vpop.f32.mrf.mxu0 }
 0x1b4   :  { %1744 = vmatmul.mubr.msk.f32.gmra.mxu1 %vm545_vm1, %v535_v9 }
 0x1b5   :  { %v537_v10 = vpop.f32.mrf.mxu0  ;;  %1754 = vmatprep.mubr.msk.f32.mxu1 %vm82_vm0, %v2075_v11 }
 0x26c   :  { %v1742_v30 = vpop.f32.mrf.mxu1 }
 0x26d   :  { %v630_v35 = vadd.f32 %v1742_v30, %v2082_v32 }
 0x26e   :  { %v624_v33 = vpop.f32.mrf.mxu1 }
 0x26f   :  { %v625_v39 = vadd.f32 %v2082_v32, %v624_v33  ;;  %v644_v43 = vadd.f32 %v630_v35, %v525_v0  ;;  %v257_v0 = vadd.f32 %v256_v16, %v2040_v49 }
 0x271   :  { %v643_v46 = vadd.f32 %v625_v39, %v520_v62  ;;  %v648_v48 = vmax.f32 %v644_v43, 0.0  ;;  %v251_v62 = vadd.f32 %v250_v12, %v2028_v31 }
 0x273   :  { %v647_v50 = vmax.f32 %v643_v46, 0.0 }
 0x274   :  { %v1745_v34 = vpop.f32.mrf.mxu1 }
 0x275   :  { %v640_v36 = vadd.f32 %v1745_v34, %v2082_v32 }
 0x276   :  { %v634_v38 = vpop.f32.mrf.mxu1 }
 0x277   :  { %v646_v40 = vadd.f32 %v640_v36, %v535_v9  ;;  %v635_v41 = vadd.f32 %v2082_v32, %v634_v38 }
 0x279   :  { %v650_v44 = vmax.f32 %v646_v40, 0.0  ;;  %v645_v45 = vadd.f32 %v635_v41, %v530_v2  ;;  %v263_v2 = vadd.f32 %v262_v22, %v2043_v51 }
 0x27b   :  { %v649_v47 = vmax.f32 %v645_v45, 0.0  ;;  %1746 = vmatprep.subr.mxu1 %v650_v44 }
 0x27c   :  { %1747 = vmatpush3.msra.mxu1 %v650_v44 }
 0x27d   :  { %1748 = vmatprep.subr.mxu1 %v649_v47 }
 0x27e   :  { %1749 = vmatpush3.msra.mxu1 %v649_v47 }
 0x27f   :  { %1750 = vmatprep.subr.mxu1 %v648_v48 }
 0x280   :  { %1751 = vmatpush3.msra.mxu1 %v648_v48 }
 0x281   :  { %1752 = vmatprep.subr.mxu1 %v647_v50 }
 0x282   :  { %1753 = vmatpush3.msra.mxu1 %v647_v50 }
 0x283   :  { %1755 = vmatmul.mubr.msk.f32.vlgmr.msra.gmra.mxu1 %vm82_vm0, %v2091_v52  ;;  %885 = vmatprep.subr.mxu1 %v445_v53 }
 0x284   :  { %886 = vmatpush1.xpose.msra.mxu1 %v443_v56  ;;  %1757 = vmatprep.mubr.msk.f32.mxu1 %vm82_vm0, %v2097_v54 }
 0x285   :  { %887 = vmatprep.subr.mxu1 %v439_v57 }
 0x287   :  { %1758 = vmatmul.mubr.msk.f32.gmra.mxu1 %vm82_vm0, %v2108_v58 }
 0x288   :  { %888 = vmatpush1.xpose.msra.mxu1 %v437_v37  ;;  %921 = vmatprep.mubr.f32.mxu1 %v253_v59 }
 0x28b   :  { %922 = vmatmul.mubr.f32.vlgmr.msra.gmra.mxu1 %v251_v62 }
 0x28c   :  { %926 = vmatprep.mubr.f32.mxu1 %v259_v63 }
 0x28f   :  { %927 = vmatmul.mubr.f32.gmra.mxu1 %v257_v0 }
 0x290   :  { %931 = vmatprep.mubr.f32.mxu1 %v265_v1 }
 0x293   :  { %932 = vmatmul.mubr.f32.gmra.mxu1 %v263_v2 }
 0x294   :  { %936 = vmatprep.mubr.f32.mxu1 %v271_v42 }
 0x297   :  { %937 = vmatmul.mubr.f32.gmra.mxu1 %v269_v4 }
 0x298   :  { %1778 = vmatprep.mubr.msk.f32.mxu1 %vm82_vm0, %v2075_v11 }
 0x343   :  { %v1756_v31 = vpop.f32.mrf.mxu1 }
 0x345   :  { %v729_v9 = vpop.f32.mrf.mxu1 }
 0x346   :  { %1684 = vmatmul.mubr.msk.f32.vlgmr.msra.gmra.mxu0 %vm545_vm1, %v729_v9 }
 0x347   :  { %1761 = vmatpush3.msra.mxu0 %v2056_v60  ;;  %v1759_v49 = vpop.f32.mrf.mxu1  ;;  %830 = vmatprep.mubr.f32.mxu0 %v1810_v3 }
 0x348   :  { %1762 = vmatprep.subr.mxu0 %v2064_v61 }
 0x349   :  { %1763 = vmatpush3.msra.mxu0 %v2064_v61  ;;  %v739_v51 = vpop.f32.mrf.mxu1 }
 0x34a   :  { %1172 = vmatprep.subr.mxu0 %v445_v53  ;;  %1685 = vmatmul.mubr.msk.f32.gmra.mxu0 %vm545_vm1, %v1756_v31 }
 0x34b   :  { %v923_v55 = vpop.f32.mrf.mxu1  ;;  %836 = vmatprep.mubr.f32.mxu0 %v1810_v3 }
 0x34d   :  { %v925_v10 = vpop.f32.mrf.mxu1 }
 0x34e   :  { %1686 = vmatmul.mubr.msk.f32.gmra.mxu0 %vm545_vm1, %v739_v51 }
 0x34f   :  { %v928_v11 = vpop.f32.mrf.mxu1  ;;  %842 = vmatprep.mubr.f32.mxu0 %v1810_v3 }
 0x351   :  { %v930_v60 = vpop.f32.mrf.mxu1 }
 0x352   :  { %1687 = vmatmul.mubr.msk.f32.gmra.mxu0 %vm545_vm1, %v1759_v49 }
 0x353   :  { %v933_v12 = vpop.f32.mrf.mxu1  ;;  %1764 = vmatprep.mubr.msk.f32.mxu0 %vm545_vm1, %v923_v55 }
 0x355   :  { %v935_v61 = vpop.f32.mrf.mxu1 }
 0x356   :  { %1765 = vmatmul.mubr.msk.f32.vlgmr.msra.gmra.mxu0 %vm545_vm1, %v928_v11 }
 0x357   :  { %1173 = vmatpush1.msra.mxu0 %v443_v56  ;;  %v938_v15 = vpop.f32.mrf.mxu1  ;;  %1767 = vmatprep.mubr.msk.f32.mxu0 %vm545_vm1, %v933_v12  ;;  %v1242_v56 = vld [vmem:[%s2387_s8 + $0x8] sm:$0xff] }
 0x358   :  { %1174 = vmatprep.subr.mxu0 %v439_v57  ;;  %v1243_v57 = vld [vmem:[%s2387_s8 + $0x10] sm:$0xff] }
 0x359   :  { %1175 = vmatpush1.msra.mxu0 %v437_v37  ;;  %v940_v16 = vpop.f32.mrf.mxu1 }
 0x35a   :  { %1768 = vmatmul.mubr.msk.f32.gmra.mxu0 %vm545_vm1, %v938_v15 }
 0x35b   :  { %1208 = vmatprep.mubr.f32.mxu0 %v1810_v3 }
 0x406   :  { %v826_v21 = vpop.f32.mrf.mxu0 }
 0x408   :  { %v828_v22 = vpop.f32.mrf.mxu0 }
 0x40a   :  { %v832_v23 = vpop.f32.mrf.mxu0 }
 0x40c   :  { %v834_v24 = vpop.f32.mrf.mxu0 }
 0x40e   :  { %v838_v25 = vpop.f32.mrf.mxu0 }
 0x410   :  { %v840_v26 = vpop.f32.mrf.mxu0 }
 0x412   :  { %v844_v27 = vpop.f32.mrf.mxu0 }
 0x414   :  { %v846_v28 = vpop.f32.mrf.mxu0 }
 0x416   :  { %v1766_v29 = vpop.f32.mrf.mxu0 }
 0x417   :  { %v1026_v34 = vadd.f32 %v1766_v29, %v2082_v32 }
 0x418   :  { %v1020_v30 = vpop.f32.mrf.mxu0 }
 0x419   :  { %v1021_v38 = vadd.f32 %v2082_v32, %v1020_v30  ;;  %v1040_v41 = vadd.f32 %v1026_v34, %v928_v11 }
 0x41a   :  { %v1769_v33 = vpop.f32.mrf.mxu0 }
 0x41b   :  { %v1036_v35 = vadd.f32 %v1769_v33, %v2082_v32  ;;  %v1039_v45 = vadd.f32 %v1021_v38, %v923_v55  ;;  %v1044_v47 = vmax.f32 %v1040_v41, 0.0 }
 0x41c   :  { %v1030_v36 = vpop.f32.mrf.mxu0 }
 0x41d   :  { %v1042_v39 = vadd.f32 %v1036_v35, %v938_v15  ;;  %v1031_v40 = vadd.f32 %v2082_v32, %v1030_v36  ;;  %v1043_v48 = vmax.f32 %v1039_v45, 0.0 }
 0x41f   :  { %v1046_v43 = vmax.f32 %v1042_v39, 0.0  ;;  %v1041_v44 = vadd.f32 %v1031_v40, %v933_v12 }
 0x421   :  { %v1045_v46 = vmax.f32 %v1041_v44, 0.0  ;;  %1770 = vmatprep.subr.mxu1 %v1046_v43 }
 0x422   :  { %1771 = vmatpush3.msra.mxu1 %v1046_v43 }
 0x423   :  { %1772 = vmatprep.subr.mxu1 %v1045_v46 }
 0x424   :  { %1773 = vmatpush3.msra.mxu1 %v1045_v46 }
 0x425   :  { %1774 = vmatprep.subr.mxu1 %v1044_v47 }
 0x426   :  { %1775 = vmatpush3.msra.mxu1 %v1044_v47 }
 0x427   :  { %1776 = vmatprep.subr.mxu1 %v1043_v48 }
 0x428   :  { %1777 = vmatpush3.msra.mxu1 %v1043_v48 }
 0x429   :  { %1779 = vmatmul.mubr.msk.f32.vlgmr.msra.gmra.mxu1 %vm82_vm0, %v2091_v52  ;;  %1297 = vmatprep.subr.mxu1 %v846_v28 }
 0x42a   :  { %1298 = vmatpush1.msra.mxu1 %v844_v27  ;;  %1781 = vmatprep.mubr.msk.f32.mxu1 %vm82_vm0, %v2097_v54  ;;  %v1241_v54 = vld [vmem:[%s2387_s8] sm:$0xff] }
 0x42b   :  { %1299 = vmatprep.subr.mxu1 %v840_v26 }
 0x42c   :  { %1300 = vmatpush1.msra.mxu1 %v838_v25 }
 0x42d   :  { %1301 = vmatprep.subr.mxu1 %v834_v24  ;;  %1782 = vmatmul.mubr.msk.f32.gmra.mxu1 %vm82_vm0, %v2108_v58  ;;  %v1244_v58 = vld [vmem:[%s2387_s8 + $0x18] sm:$0xff] }
 0x42e   :  { %1302 = vmatpush1.msra.mxu1 %v832_v23  ;;  %1337 = vmatprep.mubr.f32.mxu1 %v1810_v3 }
 0x42f   :  { %1303 = vmatprep.subr.mxu1 %v828_v22 }
 0x430   :  { %1304 = vmatpush1.msra.mxu1 %v826_v21 }
 0x431   :  { %1700 = vmatmul.mubr.msk.f32.vlgmr.msra.gmra.mxu1 %vm82_vm0, %v1241_v54 }
 0x432   :  { %1343 = vmatprep.mubr.f32.mxu1 %v1810_v3 }
 0x435   :  { %1701 = vmatmul.mubr.msk.f32.gmra.mxu1 %vm82_vm0, %v1242_v56 }
 0x436   :  { %1349 = vmatprep.mubr.f32.mxu1 %v1810_v3 }
 0x439   :  { %1702 = vmatmul.mubr.msk.f32.gmra.mxu1 %vm82_vm0, %v1243_v57 }
 0x43a   :  { %1355 = vmatprep.mubr.f32.mxu1 %v1810_v3 }
 0x43d   :  { %1703 = vmatmul.mubr.msk.f32.gmra.mxu1 %vm82_vm0, %v1244_v58 }
 0x4e9   :  { %v1780_v32 = vpop.f32.mrf.mxu1 }
 0x4eb   :  { %v1113_v50 = vpop.f32.mrf.mxu1 }
 0x4ec   :  { %1696 = vmatmul.mubr.msk.f32.vlgmr.msra.gmra.mxu0 %vm545_vm1, %v1113_v50 }
 0x4ed   :  { %1214 = vmatprep.mubr.f32.mxu0 %v1810_v3  ;;  %v1783_v52 = vpop.f32.mrf.mxu1 }
 0x4ef   :  { %v1123_v53 = vpop.f32.mrf.mxu1 }
 0x4f0   :  { %1697 = vmatmul.mubr.msk.f32.gmra.mxu0 %vm545_vm1, %v1780_v32 }
 0x4f1   :  { %1220 = vmatprep.mubr.f32.mxu0 %v1810_v3  ;;  %v2183_v4 = vpop.f32.mrf.mxu1 }
 0x4f2   :  { %v1475_v55 = vmul.f32 %v2183_v4, %v2183_v4 }
 0x4f3   :  { %v2185_v31 = vpop.f32.mrf.mxu1 }
 0x4f4   :  { %1698 = vmatmul.mubr.msk.f32.gmra.mxu0 %vm545_vm1, %v1123_v53  ;;  %v1476_v10 = vmul.f32 %v2185_v31, %v2185_v31 }
 0x4f5   :  { %1226 = vmatprep.mubr.f32.mxu0 %v1810_v3  ;;  %v2187_v9 = vpop.f32.mrf.mxu1 }
 0x4f6   :  { %v1479_v60 = vmul.f32 %v2187_v9, %v2187_v9  ;;  %v1491_v21 = vadd.f32 %v1476_v10, %v1475_v55 }
 0x4f7   :  { %v2189_v49 = vpop.f32.mrf.mxu1 }
 0x4f8   :  { %1699 = vmatmul.mubr.msk.f32.gmra.mxu0 %vm545_vm1, %v1783_v52  ;;  %v1480_v61 = vmul.f32 %v2189_v49, %v2189_v49  ;;  %v1456_v23 = vadd.f32 %v2189_v49, %v2187_v9 }
 0x4f9   :  { %1426 = vmatprep.mubr.f32.mxu0 %v1810_v3  ;;  %v2191_v51 = vpop.f32.mrf.mxu1 }
 0x4fa   :  { %v1483_v25 = vmul.f32 %v2191_v51, %v2191_v51  ;;  %v1496_v33 = vadd.f32 %v1480_v61, %v1479_v60 }
 0x4fb   :  { %v2199_v11 = vpop.f32.mrf.mxu1 }
 0x4fc   :  { %v1484_v29 = vmul.f32 %v2199_v11, %v2199_v11  ;;  %v1461_v36 = vadd.f32 %v2199_v11, %v2191_v51 }
 0x4fd   :  { %v2210_v22 = vpop.f32.mrf.mxu1 }
 0x4fe   :  { %v1501_v44 = vadd.f32 %v1484_v29, %v1483_v25  ;;  %v1487_v45 = vmul.f32 %v2210_v22, %v2210_v22 }
 0x4ff   :  { %v2230_v39 = vpop.f32.mrf.mxu1 }
 0x500   :  { %v1466_v47 = vadd.f32 %v2230_v39, %v2210_v22  ;;  %v1488_v48 = vmul.f32 %v2230_v39, %v2230_v39 }
 0x5ac   :  { %v1210_v59 = vpop.f32.mrf.mxu0 }
 0x5ae   :  { %v1212_v37 = vpop.f32.mrf.mxu0 }
 0x5b0   :  { %v1216_v62 = vpop.f32.mrf.mxu0 }
 0x5b2   :  { %v1218_v63 = vpop.f32.mrf.mxu0 }
 0x5b4   :  { %v1222_v0 = vpop.f32.mrf.mxu0 }
 0x5b6   :  { %v1224_v1 = vpop.f32.mrf.mxu0 }
 0x5b8   :  { %v1228_v2 = vpop.f32.mrf.mxu0 }
 0x5ba   :  { %v1230_v42 = vpop.f32.mrf.mxu0 }
 0x5bb   :  { %1386 = vmatprep.subr.mxu0 %v1230_v42 }
 0x5bc   :  { %1387 = vmatpush1.msra.mxu0 %v1228_v2 }
 0x5bd   :  { %1388 = vmatprep.subr.mxu0 %v1224_v1 }
 0x5be   :  { %1389 = vmatpush1.msra.mxu0 %v1222_v0 }
 0x5bf   :  { %1390 = vmatprep.subr.mxu0 %v1218_v63 }
 0x5c0   :  { %1391 = vmatpush1.msra.mxu0 %v1216_v62 }
 0x5c1   :  { %1392 = vmatprep.subr.mxu0 %v1212_v37 }
 0x5c2   :  { %1393 = vmatpush1.msra.mxu0 %v1210_v59 }
 0x5c3   :  { %1704 = vmatmul.mubr.msk.f32.vlgmr.msra.gmra.mxu0 %vm82_vm0, %v1241_v54 }
 0x5c4   :  { %1432 = vmatprep.mubr.f32.mxu0 %v1810_v3 }
 0x5c7   :  { %1705 = vmatmul.mubr.msk.f32.gmra.mxu0 %vm82_vm0, %v1242_v56 }
 0x5c8   :  { %1438 = vmatprep.mubr.f32.mxu0 %v1810_v3 }
 0x5cb   :  { %1706 = vmatmul.mubr.msk.f32.gmra.mxu0 %vm82_vm0, %v1243_v57 }
 0x5cc   :  { %1444 = vmatprep.mubr.f32.mxu0 %v1810_v3  ;;  %v1451_v3 = vadd.f32 %v2185_v31, %v2183_v4 }
 0x5cf   :  { %1707 = vmatmul.mubr.msk.f32.gmra.mxu0 %vm82_vm0, %v1244_v58  ;;  %v1506_v58 = vadd.f32 %v1488_v48, %v1487_v45 }
 0x683   :  { %v2203_v12 = vpop.f32.mrf.mxu0 }
 0x684   :  { %v1477_v15 = vmul.f32 %v2203_v12, %v2203_v12  ;;  %v1452_v16 = vadd.f32 %v1451_v3, %v2203_v12 }
 0x685   :  { %v2214_v24 = vpop.f32.mrf.mxu0 }
 0x686   :  { %v1453_v26 = vadd.f32 %v1452_v16, %v2214_v24  ;;  %v1478_v27 = vmul.f32 %v2214_v24, %v2214_v24  ;;  %v1492_v28 = vadd.f32 %v1491_v21, %v1477_v15 }
 0x687   :  { %v2223_v30 = vpop.f32.mrf.mxu0 }
 0x688   :  { %v1481_v34 = vmul.f32 %v2223_v30, %v2223_v30  ;;  %1454 = vadd.xlane.f32.xlu0 %v1453_v26  ;;  %v1493_v35 = vadd.f32 %v1492_v28, %v1478_v27  ;;  %v1457_v38 = vadd.f32 %v1456_v23, %v2223_v30 }
 0x689   :  { %v2232_v40 = vpop.f32.mrf.mxu0 }
 0x68a   :  { %1494 = vadd.xlane.f32.xlu1 %v1493_v35  ;;  %v1482_v41 = vmul.f32 %v2232_v40, %v2232_v40  ;;  %v1497_v43 = vadd.f32 %v1496_v33, %v1481_v34  ;;  %v1458_v52 = vadd.f32 %v1457_v38, %v2232_v40 }
 0x68b   :  { %v2238_v46 = vpop.f32.mrf.mxu0 }
 0x68c   :  { %v1485_v32 = vmul.f32 %v2238_v46, %v2238_v46  ;;  %v1498_v50 = vadd.f32 %v1497_v43, %v1482_v41  ;;  %v1462_v53 = vadd.f32 %v1461_v36, %v2238_v46 }
 0x68d   :  { %v2248_v54 = vpop.f32.mrf.mxu0 }
 0x68e   :  { %1499 = vadd.xlane.f32.xlu0 %v1498_v50  ;;  %1459 = vadd.xlane.f32.xlu1 %v1458_v52  ;;  %v1486_v56 = vmul.f32 %v2248_v54, %v2248_v54  ;;  %v1502_v57 = vadd.f32 %v1501_v44, %v1485_v32  ;;  %v1463_v62 = vadd.f32 %v1462_v53, %v2248_v54 }
 0x68f   :  { %v2252_v59 = vpop.f32.mrf.mxu0 }
 0x690   :  { %v1489_v37 = vmul.f32 %v2252_v59, %v2252_v59  ;;  %v1503_v63 = vadd.f32 %v1502_v57, %v1486_v56  ;;  %v1467_v0 = vadd.f32 %v1466_v47, %v2252_v59 }
 0x691   :  { %v2258_v1 = vpop.f32.mrf.mxu0 }
 0x692   :  { %1464 = vadd.xlane.f32.xlu0 %v1463_v62  ;;  %1504 = vadd.xlane.f32.xlu1 %v1503_v63  ;;  %v1468_v2 = vadd.f32 %v1467_v0, %v2258_v1  ;;  %v1490_v42 = vmul.f32 %v2258_v1, %v2258_v1  ;;  %v1507_v55 = vadd.f32 %v1506_v58, %v1489_v37  ;;  %v1527_v37 = vld [vmem:[%s2388_s9] sm:$0xff] }
 0x694   :  { %v1508_v10 = vadd.f32 %v1507_v55, %v1490_v42  ;;  %v1528_v42 = vld [vmem:[%s2388_s9 + $0x8] sm:$0xff] }
 0x696   :  { %1469 = vadd.xlane.f32.xlu0 %v1468_v2 }
 0x69a   :  { %1509 = vadd.xlane.f32.xlu0 %v1508_v10 }
 0x711   :  { %v1455_v3 = vpop.xlane.xlu0 %1454 }
 0x712   :  { %v1471_v60 = vmul.f32 0.001953125, %v1455_v3 }
 0x713   :  { %v1495_v61 = vpop.xlane.xlu1 %1494 }
 0x714   :  { %v1515_v15 = vmul.f32 %v1471_v60, %v1471_v60  ;;  %v1511_v16 = vmul.f32 0.001953125, %v1495_v61  ;;  %v1529_v61 = vld [vmem:[%s2388_s9 + $0x10] sm:$0xff] }
 0x716   :  { %v1519_v21 = vsub.f32 %v1511_v16, %v1515_v15  ;;  %v1543_v15 = vld [vmem:[%s2389_s10] sm:$0xff] }
 0x717   :  { %v1500_v23 = vpop.xlane.xlu0 %1499  ;;  %v1460_v25 = vpop.xlane.xlu1 %1459 }
 0x718   :  { %v1523_v26 = vmax.f32 %v1519_v21, 0.0  ;;  %v1472_v27 = vmul.f32 0.001953125, %v1460_v25  ;;  %v1512_v29 = vmul.f32 0.001953125, %v1500_v23 }
 0x71a   :  { %v1531_v28 = vadd.f32 0.0001, %v1523_v26  ;;  %v1516_v33 = vmul.f32 %v1472_v27, %v1472_v27  ;;  %v1544_v26 = vld [vmem:[%s2389_s10 + $0x8] sm:$0xff] }
 0x71b   :  { %v1465_v34 = vpop.xlane.xlu0 %1464  ;;  %v1505_v35 = vpop.xlane.xlu1 %1504 }
 0x71c   :  { %1796 = vrsqrt.f32 %v1531_v28  ;;  %v1520_v36 = vsub.f32 %v1512_v29, %v1516_v33  ;;  %v1473_v38 = vmul.f32 0.001953125, %v1465_v34  ;;  %v1513_v44 = vmul.f32 0.001953125, %v1505_v35  ;;  %v1530_v29 = vld [vmem:[%s2388_s9 + $0x18] sm:$0xff] }
 0x71e   :  { %v1524_v41 = vmax.f32 %v1520_v36, 0.0  ;;  %v1517_v43 = vmul.f32 %v1473_v38, %v1473_v38 }
 0x71f   :  { %v1470_v45 = vpop.xlane.xlu0 %1469 }
 0x720   :  { %v1532_v47 = vadd.f32 0.0001, %v1524_v41  ;;  %v1521_v48 = vsub.f32 %v1513_v44, %v1517_v43  ;;  %v1474_v32 = vmul.f32 0.001953125, %v1470_v45  ;;  %v1546_v41 = vld [vmem:[%s2389_s10 + $0x18] sm:$0xff] }
 0x722   :  { %1798 = vrsqrt.f32 %v1532_v47  ;;  %v1525_v50 = vmax.f32 %v1521_v48, 0.0  ;;  %v1518_v56 = vmul.f32 %v1474_v32, %v1474_v32 }
 0x723   :  { %v1510_v52 = vpop.xlane.xlu0 %1509 }
 0x724   :  { %v1533_v53 = vadd.f32 0.0001, %v1525_v50  ;;  %v1514_v57 = vmul.f32 0.001953125, %v1510_v52 }
 0x726   :  { %1800 = vrsqrt.f32 %v1533_v53  ;;  %v1522_v58 = vsub.f32 %v1514_v57, %v1518_v56 }
 0x728   :  { %v1526_v62 = vmax.f32 %v1522_v58, 0.0 }
 0x729   :  { %v1797_v63 = vpop.eup %1796 }
 0x72a   :  { %v1534_v0 = vadd.f32 0.0001, %v1526_v62  ;;  %v1539_v2 = vmul.f32 %v1797_v63, %v1527_v37 }
 0x72c   :  { %1802 = vrsqrt.f32 %v1534_v0  ;;  %1557 = vperm.xlu1 %1795, %v1539_v2   ;;  %v1547_v3 = vmul.f32 %v1539_v2, %v1471_v60  ;;  %v1545_v60 = vld [vmem:[%s2389_s10 + $0x10] sm:$0xff] }
 0x72e   :  { %v1551_v25 = vsub.f32 %v1543_v15, %v1547_v3 }
 0x72f   :  { %v1799_v55 = vpop.eup %1798 }
 0x730   :  { %v1540_v10 = vmul.f32 %v1799_v55, %v1528_v42 }
 0x732   :  { %1562 = vperm.xlu0 %1794, %v1540_v10   ;;  %v1548_v21 = vmul.f32 %v1540_v10, %v1472_v27 }
 0x733   :  { %v1801_v16 = vpop.eup %1800 }
 0x734   :  { %v1541_v23 = vmul.f32 %v1801_v16, %v1529_v61  ;;  %v1552_v33 = vsub.f32 %v1544_v26, %v1548_v21 }
 0x736   :  { %1567 = vperm.xlu1 %1795, %v1541_v23   ;;  %1609 = vperm.xlu0 %1794, %v1551_v25   ;;  %v1549_v28 = vmul.f32 %v1541_v23, %v1473_v38 }
 0x738   :  { %v1553_v34 = vsub.f32 %v1545_v60, %v1549_v28 }
 0x739   :  { %v1803_v27 = vpop.eup %1802 }
 0x73a   :  { %1614 = vperm.xlu1 %1795, %v1552_v33   ;;  %1619 = vperm.xlu0 %1794, %v1553_v34   ;;  %v1542_v35 = vmul.f32 %v1803_v27, %v1530_v29 }
 0x73c   :  { %v1550_v36 = vmul.f32 %v1542_v35, %v1474_v32 }
 0x73e   :  { %1572 = vperm.xlu1 %1795, %v1542_v35   ;;  %v1554_v43 = vsub.f32 %v1546_v41, %v1550_v36 }
 0x742   :  { %1624 = vperm.xlu1 %1795, %v1554_v43  }
 0x7a7   :  { %v1558_v44 = vpop.permute.xlu1 %1557 }
 0x7a8   :  { %v1575_v38 = vmul.f32 %v1558_v44, %v2183_v4  ;;  %v1576_v45 = vmul.f32 %v1558_v44, %v2185_v31  ;;  %v1577_v47 = vmul.f32 %v1558_v44, %v2203_v12  ;;  %v1578_v48 = vmul.f32 %v1558_v44, %v2214_v24 }
 0x7aa   :  { %v1591_v57 = vadd.f32 %v1575_v38, %v1906_v8  ;;  %v1592_v58 = vadd.f32 %v1576_v45, %v1899_v7  ;;  %v1593_v4 = vadd.f32 %v1577_v47, %v1973_v20  ;;  %v1594_v31 = vadd.f32 %v1578_v48, %v1966_v19 }
 0x7ad   :  { %v1563_v50 = vpop.permute.xlu0 %1562 }
 0x7ae   :  { %v1579_v52 = vmul.f32 %v1563_v50, %v2187_v9  ;;  %v1580_v32 = vmul.f32 %v1563_v50, %v2189_v49  ;;  %v1581_v53 = vmul.f32 %v1563_v50, %v2223_v30  ;;  %v1582_v56 = vmul.f32 %v1563_v50, %v2232_v40 }
 0x7b0   :  { %v1595_v24 = vadd.f32 %v1579_v52, %v1894_v6  ;;  %v1596_v9 = vadd.f32 %v1580_v32, %v1889_v5  ;;  %v1597_v49 = vadd.f32 %v1581_v53, %v1959_v18  ;;  %v1598_v30 = vadd.f32 %v1582_v56, %v1953_v17  ;;  %v1804_v5 = vld [vmem:[%s2379_s0 + $0x40] sm:$0xff]  ;;  %v1805_v17 = vld [vmem:[%s2379_s0 + $0x48] sm:$0xff] }
 0x7b1   :  { %v1568_v12 = vpop.permute.xlu1 %1567  ;;  %v1610_v37 = vpop.permute.xlu0 %1609 }
 0x7b2   :  { %v1583_v40 = vmul.f32 %v1568_v12, %v2191_v51  ;;  %v1584_v8 = vmul.f32 %v1568_v12, %v2199_v11  ;;  %v1585_v7 = vmul.f32 %v1568_v12, %v2238_v46  ;;  %v1586_v20 = vmul.f32 %v1568_v12, %v2248_v54 }
 0x7b3   :  { %v1627_v62 = vadd.f32 %v1610_v37, %v1591_v57  ;;  %v1628_v19 = vadd.f32 %v1610_v37, %v1592_v58  ;;  %v1629_v63 = vadd.f32 %v1610_v37, %v1593_v4  ;;  %v1630_v0 = vadd.f32 %v1610_v37, %v1594_v31 }
 0x7b4   :  { %v1599_v6 = vadd.f32 %v1804_v5, %v1583_v40  ;;  %v1600_v18 = vadd.f32 %v1805_v17, %v1584_v8  ;;  %v1601_v51 = vadd.f32 %v1585_v7, %v1939_v14  ;;  %v1602_v11 = vadd.f32 %v1586_v20, %v1934_v13 }
 0x7b5   :  { %1643 = vst [vmem:[%s2390_s11] sm:$0xff] %v1627_v62  ;;  %1644 = vst [vmem:[%s2390_s11 + $0x8] sm:$0xff] %v1628_v19  ;;  %v1615_v46 = vpop.permute.xlu1 %1614  ;;  %v1620_v14 = vpop.permute.xlu0 %1619 }
 0x7b6   :  { %1645 = vst [vmem:[%s2390_s11 + $0x10] sm:$0xff] %v1629_v63  ;;  %1646 = vst [vmem:[%s2390_s11 + $0x18] sm:$0xff] %v1630_v0  ;;  %v1631_v54 = vadd.f32 %v1615_v46, %v1595_v24  ;;  %v1632_v13 = vadd.f32 %v1615_v46, %v1596_v9  ;;  %v1633_v2 = vadd.f32 %v1615_v46, %v1597_v49 }
 0x7b7   :  { %v1634_v42 = vadd.f32 %v1615_v46, %v1598_v30  ;;  %v1635_v55 = vadd.f32 %v1620_v14, %v1599_v6  ;;  %v1636_v10 = vadd.f32 %v1620_v14, %v1600_v18  ;;  %v1637_v3 = vadd.f32 %v1620_v14, %v1601_v51 }
 0x7b8   :  { %v1638_v61 = vadd.f32 %v1620_v14, %v1602_v11  ;;  %1647 = vst [vmem:[%s2390_s11 + $0x20] sm:$0xff] %v1631_v54  ;;  %1648 = vst [vmem:[%s2390_s11 + $0x28] sm:$0xff] %v1632_v13 }
 0x7b9   :  { %1649 = vst [vmem:[%s2390_s11 + $0x30] sm:$0xff] %v1633_v2  ;;  %1650 = vst [vmem:[%s2390_s11 + $0x38] sm:$0xff] %v1634_v42  ;;  %v1573_v15 = vpop.permute.xlu1 %1572 }
 0x7ba   :  { %1651 = vst [vmem:[%s2390_s11 + $0x40] sm:$0xff] %v1635_v55  ;;  %1652 = vst [vmem:[%s2390_s11 + $0x48] sm:$0xff] %v1636_v10  ;;  %v1587_v16 = vmul.f32 %v1573_v15, %v2210_v22  ;;  %v1588_v21 = vmul.f32 %v1573_v15, %v2230_v39  ;;  %v1589_v23 = vmul.f32 %v1573_v15, %v2252_v59 }
 0x7bb   :  { %1653 = vst [vmem:[%s2390_s11 + $0x50] sm:$0xff] %v1637_v3  ;;  %1654 = vst [vmem:[%s2390_s11 + $0x58] sm:$0xff] %v1638_v61  ;;  %v1590_v25 = vmul.f32 %v1573_v15, %v2258_v1 }
 0x7bd   :  { %v1625_v1 = vpop.permute.xlu1 %1624 }
 0x7c2   :  { %v1806_v26 = vld [vmem:[%s2379_s0 + $0x60] sm:$0xff]  ;;  %v1807_v28 = vld [vmem:[%s2379_s0 + $0x68] sm:$0xff]  ;;  %v1808_v22 = vld [vmem:[%s2379_s0 + $0x70] sm:$0xff] }
 0x7c3   :  { %v1603_v60 = vadd.f32 %v1806_v26, %v1587_v16  ;;  %v1604_v29 = vadd.f32 %v1807_v28, %v1588_v21  ;;  %v1605_v33 = vadd.f32 %v1808_v22, %v1589_v23  ;;  %v1809_v39 = vld [vmem:[%s2379_s0 + $0x78] sm:$0xff] }
 0x7c4   :  { %v1606_v59 = vadd.f32 %v1809_v39, %v1590_v25 }
 0x7c5   :  { %v1639_v34 = vadd.f32 %v1625_v1, %v1603_v60  ;;  %v1640_v27 = vadd.f32 %v1625_v1, %v1604_v29  ;;  %v1641_v35 = vadd.f32 %v1625_v1, %v1605_v33 }
 0x7c6   :  { %v1642_v36 = vadd.f32 %v1625_v1, %v1606_v59 }
 0x7c7   :  { %1655 = vst [vmem:[%s2390_s11 + $0x60] sm:$0xff] %v1639_v34  ;;  %1656 = vst [vmem:[%s2390_s11 + $0x68] sm:$0xff] %v1640_v27 }
 0x7c8   :  { %1657 = vst [vmem:[%s2390_s11 + $0x70] sm:$0xff] %v1641_v35  ;;  %1658 = vst [vmem:[%s2390_s11 + $0x78] sm:$0xff] %v1642_v36 }

</bundles_post_ra>
